<compile_context>
chip_gen: v6e
topology: v6e:2x2x1
jax: 0.10.0
libtpu: 0.0.40
codegen_flags: <defaults>
</compile_context>

<pallas_src>
import jax
import jax.numpy as jnp
from jax.experimental import pallas as pl
from jax.experimental.pallas import tpu as pltpu

# ---- logical dims (from the PyTorch module) ----
D_IN = 2048        # flattened resnet features
D_FC = 256         # fc: 2048 -> 128*2
D_FC1 = 101        # fc1: 256 -> 101
D_FC2 = 10         # fc2: 101 -> 10
D_FC3 = 1          # fc3: 10 -> 1

# ---- TPU-friendly dims ----
D_FCC = 128        # compact fc width after folding the [1,0]*128 help mask
D_PAD = 128        # lane padding for the small heads (x1 lanes 0..100, x2 lane 101)
X2_LANE = D_FC1    # lane 101 of the combined x1/x2 output carries x2
TB_MAX = 512       # max batch tile: double-buffered f32 x tile + outputs ~11 MiB
                   # fits v5e's 16 MiB default scoped VMEM (v6e/v7x have more)


def fc_head_kernel(x_ref, wfc_ref, bfc_ref, s_ref, w1_ref, b1_ref,
                   w23_ref, b23_ref, y_ref, x12_ref):
    """One batch tile of the baseline_FC_ER head (weights VMEM-resident)."""
    # f32 features straight from HBM; bf16 cast on the VPU (no XLA cast pass).
    x = x_ref[...].astype(jnp.bfloat16)                                # (TB, 2048)

    # yc = fc(x)[:, ::2]  (help mask folded into the weights)
    yc = jnp.dot(x, wfc_ref[...], preferred_element_type=jnp.float32)
    yc = yc + bfc_ref[...]                                             # (TB, 128) f32

    # y = yc interleaved with zeros (= fc(x) * help), produced in-kernel via a
    # 0/1 scatter matmul (MXU has huge slack in this DMA-bound kernel).
    y_ref[...] = jnp.dot(yc, s_ref[...], preferred_element_type=jnp.float32)

    # x = dropout(relu(y))  -- dropout is identity in eval mode; odd lanes of y
    # are zero so only the compact 128 lanes matter.
    h = jnp.maximum(yc, 0.0).astype(jnp.bfloat16)

    # x1 = fc1(x)  (zeroed odd input rows of W1 already dropped; lanes 101..127 == 0)
    x1 = jnp.dot(h, w1_ref[...], preferred_element_type=jnp.float32) + b1_ref[...]

    # x2 = fc3(fc2(x1)) folded into a single matmul whose only non-zero output
    # column is lane 101 -> pack x2 into the same output tile as x1.
    x12_ref[...] = x1 + jnp.dot(x1, w23_ref[...],
                                preferred_element_type=jnp.float32) + b23_ref[...]


def _pad2d(a, rows, cols, dtype):
    out = jnp.zeros((rows, cols), dtype)
    return out.at[: a.shape[0], : a.shape[1]].set(a.astype(dtype))


def init_params(key):
    """Deterministic synthetic parameters with the module's shapes.

    Weights are stored transposed relative to torch.nn.Linear, i.e. (in, out),
    so y = x @ W + b matches x @ W_torch.T + b.
    """
    ks = jax.random.split(key, 8)
    return {
        "w_fc": jax.random.normal(ks[0], (D_IN, D_FC), jnp.float32) * 0.02,
        "b_fc": jax.random.normal(ks[1], (D_FC,), jnp.float32) * 0.02,
        "w1": jax.random.normal(ks[2], (D_FC, D_FC1), jnp.float32) * 0.02,
        "b1": jax.random.normal(ks[3], (D_FC1,), jnp.float32) * 0.02,
        "w2": jax.random.normal(ks[4], (D_FC1, D_FC2), jnp.float32) * 0.02,
        "b2": jax.random.normal(ks[5], (D_FC2,), jnp.float32) * 0.02,
        "w3": jax.random.normal(ks[6], (D_FC2, D_FC3), jnp.float32) * 0.02,
        "b3": jax.random.normal(ks[7], (D_FC3,), jnp.float32) * 0.02,
        # self.help = [1.0, 0.0] * 128
        "help": jnp.tile(jnp.array([1.0, 0.0], jnp.float32), 128),
    }


def prepare_params(p):
    """One-time fold / pad / cast of the head parameters (call once, not per step)."""
    # help = [1,0]*128 -> only even output columns of fc survive.
    keep = jnp.arange(0, D_FC, 2)
    wfc_c = p["w_fc"][:, keep].astype(jnp.bfloat16)                    # (2048, 128) bf16
    bfc_c = p["b_fc"][keep].reshape(1, D_FCC).astype(jnp.float32)      # (1, 128)  f32

    # 0/1 scatter matrix: lane 2i of y <- compact lane i (odd lanes stay 0 == help mask).
    rows = jnp.arange(D_FCC)
    scatter = jnp.zeros((D_FCC, D_FC), jnp.float32).at[rows, 2 * rows].set(1.0)

    # fc1 only sees the surviving (even) inputs; drop the zeroed rows.
    w1_c = _pad2d(p["w1"][keep, :], D_FCC, D_PAD, jnp.bfloat16)        # (128, 128) bf16
    b1_p = _pad2d(p["b1"].reshape(1, D_FC1), 1, D_PAD, jnp.float32)    # (1, 128)  f32

    # Fold fc2 and fc3 (no nonlinearity between them) and pack the single
    # output column into lane X2_LANE so x2 rides in the x1 output tile.
    w23 = p["w2"] @ p["w3"]                                            # (101, 1)
    b23 = p["b2"] @ p["w3"] + p["b3"]                                  # (1,)
    w23_p = jnp.zeros((D_PAD, D_PAD), jnp.float32).at[:D_FC1, X2_LANE].set(w23[:, 0])
    b23_p = jnp.zeros((1, D_PAD), jnp.float32).at[0, X2_LANE].set(b23[0])

    return dict(wfc=wfc_c, bfc=bfc_c, scatter=scatter,
                w1=w1_c, b1=b1_p, w23=w23_p, b23=b23_p)


def _round_up(n, m):
    return ((n + m - 1) // m) * m


def _choose_tiling(B):
    """Pick (padded_batch, batch_tile).

    tile ~= ceil8(B/2), capped at TB_MAX, so that:
      * grid >= 2 whenever B > 8 -> v7x megacore splits the batch across both
        TensorCores and the x DMA overlaps compute on all generations,
      * double-buffered tiles stay inside every generation's default scoped VMEM.
    """
    tb = min(TB_MAX, max(8, _round_up(-(-B // 2), 8)))
    bp = _round_up(max(B, 8), tb)
    return bp, tb


def _pallas_fc_head(x_f32, pp, tb):
    Bp = x_f32.shape[0]
    grid = Bp // tb
    full = lambda i: (0, 0)     # weights: same block every step -> VMEM-resident
    batch = lambda i: (i, 0)    # activations / outputs: tiled along batch

    flops = 2 * Bp * (D_IN * D_FCC + D_FCC * D_FC + D_FCC * D_PAD + D_PAD * D_PAD)
    bytes_accessed = (
        x_f32.size * 4
        + pp["wfc"].size * 2 + pp["w1"].size * 2
        + (pp["scatter"].size + pp["w23"].size) * 4
        + (pp["bfc"].size + pp["b1"].size + pp["b23"].size) * 4
        + Bp * (D_FC + D_PAD) * 4
    )

    return pl.pallas_call(
        fc_head_kernel,
        out_shape=(
            jax.ShapeDtypeStruct((Bp, D_FC), jnp.float32),    # y (interleaved, post-mask)
            jax.ShapeDtypeStruct((Bp, D_PAD), jnp.float32),   # x1 lanes 0..100, x2 lane 101
        ),
        grid=(grid,),
        in_specs=[
            pl.BlockSpec((tb, D_IN), batch),      # x (f32, cast in-kernel)
            pl.BlockSpec((D_IN, D_FCC), full),    # wfc (bf16)
            pl.BlockSpec((1, D_FCC), full),       # bfc
            pl.BlockSpec((D_FCC, D_FC), full),    # scatter (interleave)
            pl.BlockSpec((D_FCC, D_PAD), full),   # w1 (bf16)
            pl.BlockSpec((1, D_PAD), full),       # b1
            pl.BlockSpec((D_PAD, D_PAD), full),   # w23 (packed into lane 101)
            pl.BlockSpec((1, D_PAD), full),       # b23
        ],
        out_specs=(
            pl.BlockSpec((tb, D_FC), batch),
            pl.BlockSpec((tb, D_PAD), batch),
        ),
        compiler_params=pltpu.CompilerParams(
            dimension_semantics=("parallel",)),
        cost_estimate=pl.CostEstimate(
            flops=flops, transcendentals=0, bytes_accessed=bytes_accessed),
    )(x_f32, pp["wfc"], pp["bfc"], pp["scatter"],
      pp["w1"], pp["b1"], pp["w23"], pp["b23"])


@jax.jit
def baseline_fc_er_forward(feats, prepped):
    """feats: (B, 2048, 1, 1) NCHW output of the (external) resnet backbone."""
    B = feats.shape[0]
    x = feats.reshape(B, D_IN)                       # torch.flatten(x, 1); stays f32

    Bp, tb = _choose_tiling(B)
    if Bp != B:                                      # pad only when strictly needed
        x = jnp.pad(x, ((0, Bp - B), (0, 0)))

    y_p, x12_p = _pallas_fc_head(x, prepped, tb)

    y = y_p[:B]                                      # already interleaved post-mask (B, 256)
    x1 = x12_p[:B, :D_FC1]                           # (B, 101)
    x2 = x12_p[:B, X2_LANE:X2_LANE + 1]              # (B, 1)
    return [x1, x2], y


def reference_forward(feats, params):
    """Plain-JAX f32 reference of the same head (dropout = identity)."""
    B = feats.shape[0]
    x = feats.reshape(B, D_IN).astype(jnp.float32)
    y = x @ params["w_fc"] + params["b_fc"]
    y = y * params["help"]
    h = jnp.maximum(y, 0.0)
    x1 = h @ params["w1"] + params["b1"]
    x2 = x1 @ params["w2"] + params["b2"]
    x2 = x2 @ params["w3"] + params["b3"]
    return [x1, x2], y


if __name__ == "__main__":
    key = jax.random.PRNGKey(0)
    k_feat, k_param = jax.random.split(key)

    B = 2
    feats = jax.random.normal(k_feat, (B, D_IN, 1, 1), jnp.float32)  # resnet_layer output (NCHW)
    params = init_params(k_param)
    prepped = prepare_params(params)   # one-time fold/pad/cast (hoisted out of forward)

    (x1, x2), y = baseline_fc_er_forward(feats, prepped)
    jax.block_until_ready((x1, x2, y))

    (x1_r, x2_r), y_r = reference_forward(feats, params)
    assert x1.shape == (B, D_FC1) and x2.shape == (B, D_FC3) and y.shape == (B, D_FC)
    # bf16 inputs/weights on the 2048-deep matmul -> loosened tolerances vs f32 ref.
    assert jnp.allclose(y, y_r, atol=2e-2, rtol=2e-2)
    assert jnp.allclose(x1, x1_r, atol=2e-2, rtol=2e-2)
    assert jnp.allclose(x2, x2_r, atol=2e-2, rtol=2e-2)

    print("KERNEL_OK")
</pallas_src>

<mosaic_0001>
module attributes {stable_mosaic.version = 11 : i64} {
  func.func @fc_head_kernel(%arg0: i32, %arg1: memref<8x2048xf32, #tpu.memory_space<vmem>>, %arg2: memref<2048x128xbf16, #tpu.memory_space<vmem>>, %arg3: memref<1x128xf32, #tpu.memory_space<vmem>>, %arg4: memref<128x256xf32, #tpu.memory_space<vmem>>, %arg5: memref<128x128xbf16, #tpu.memory_space<vmem>>, %arg6: memref<1x128xf32, #tpu.memory_space<vmem>>, %arg7: memref<128x128xf32, #tpu.memory_space<vmem>>, %arg8: memref<1x128xf32, #tpu.memory_space<vmem>>, %arg9: memref<8x256xf32, #tpu.memory_space<vmem>>, %arg10: memref<8x128xf32, #tpu.memory_space<vmem>>) attributes {dimension_semantics = [#tpu.dimension_semantics<parallel>], iteration_bounds = array<i64: 1>, scalar_prefetch = 0 : i64, scratch_operands = 0 : i64, tpu.core_type = #tpu.core_type<tc>, window_params = [{transform_indices = @transform_0, window_bounds = array<i64: 8, 2048>}, {pipeline_mode = #tpu.pipeline_mode<synchronous>, transform_indices = @transform_1, window_bounds = array<i64: 2048, 128>}, {pipeline_mode = #tpu.pipeline_mode<synchronous>, transform_indices = @transform_2, window_bounds = array<i64: 1, 128>}, {pipeline_mode = #tpu.pipeline_mode<synchronous>, transform_indices = @transform_3, window_bounds = array<i64: 128, 256>}, {pipeline_mode = #tpu.pipeline_mode<synchronous>, transform_indices = @transform_4, window_bounds = array<i64: 128, 128>}, {pipeline_mode = #tpu.pipeline_mode<synchronous>, transform_indices = @transform_5, window_bounds = array<i64: 1, 128>}, {pipeline_mode = #tpu.pipeline_mode<synchronous>, transform_indices = @transform_6, window_bounds = array<i64: 128, 128>}, {pipeline_mode = #tpu.pipeline_mode<synchronous>, transform_indices = @transform_7, window_bounds = array<i64: 1, 128>}, {transform_indices = @transform_8, window_bounds = array<i64: 8, 256>}, {transform_indices = @transform_9, window_bounds = array<i64: 8, 128>}]} {
    %c0 = arith.constant 0 : index
    %c0_0 = arith.constant 0 : index
    %0 = vector.load %arg1[%c0, %c0_0] : memref<8x2048xf32, #tpu.memory_space<vmem>>, vector<8x2048xf32>
    %1 = arith.truncf %0 : vector<8x2048xf32> to vector<8x2048xbf16>
    %c0_1 = arith.constant 0 : index
    %c0_2 = arith.constant 0 : index
    %2 = vector.load %arg2[%c0_1, %c0_2] : memref<2048x128xbf16, #tpu.memory_space<vmem>>, vector<2048x128xbf16>
    %cst = arith.constant dense<0.000000e+00> : vector<8x128xf32>
    %3 = tpu.matmul %1, %2, %cst {dimension_numbers = #tpu.dot_dimension_numbers<[1], [0], [0], [1], [0, 0, 1, 1], [], []>} : vector<8x2048xbf16>, vector<2048x128xbf16>, vector<8x128xf32> -> vector<8x128xf32>
    %c0_3 = arith.constant 0 : index
    %c0_4 = arith.constant 0 : index
    %4 = vector.load %arg3[%c0_3, %c0_4] : memref<1x128xf32, #tpu.memory_space<vmem>>, vector<1x128xf32>
    %5 = vector.broadcast %4 : vector<1x128xf32> to vector<8x128xf32>
    %6 = arith.addf %3, %5 : vector<8x128xf32>
    %c0_5 = arith.constant 0 : index
    %c0_6 = arith.constant 0 : index
    %7 = vector.load %arg4[%c0_5, %c0_6] : memref<128x256xf32, #tpu.memory_space<vmem>>, vector<128x256xf32>
    %cst_7 = arith.constant dense<0.000000e+00> : vector<8x256xf32>
    %8 = tpu.matmul %6, %7, %cst_7 {dimension_numbers = #tpu.dot_dimension_numbers<[1], [0], [0], [1], [0, 0, 1, 1], [], []>} : vector<8x128xf32>, vector<128x256xf32>, vector<8x256xf32> -> vector<8x256xf32>
    %c0_8 = arith.constant 0 : index
    %c0_9 = arith.constant 0 : index
    %9 = vector.load %arg9[%c0_8, %c0_9] : memref<8x256xf32, #tpu.memory_space<vmem>>, vector<8x256xf32>
    tpu.vector_store %arg9[%c0_8, %c0_9], %8 {strides = array<i32>} : memref<8x256xf32, #tpu.memory_space<vmem>>, vector<8x256xf32>,
    %cst_10 = arith.constant 0.000000e+00 : f32
    %10 = vector.broadcast %cst_10 : f32 to vector<8x128xf32>
    %11 = arith.maximumf %6, %10 : vector<8x128xf32>
    %12 = arith.truncf %11 : vector<8x128xf32> to vector<8x128xbf16>
    %c0_11 = arith.constant 0 : index
    %c0_12 = arith.constant 0 : index
    %13 = vector.load %arg5[%c0_11, %c0_12] : memref<128x128xbf16, #tpu.memory_space<vmem>>, vector<128x128xbf16>
    %cst_13 = arith.constant dense<0.000000e+00> : vector<8x128xf32>
    %14 = tpu.matmul %12, %13, %cst_13 {dimension_numbers = #tpu.dot_dimension_numbers<[1], [0], [0], [1], [0, 0, 1, 1], [], []>} : vector<8x128xbf16>, vector<128x128xbf16>, vector<8x128xf32> -> vector<8x128xf32>
    %c0_14 = arith.constant 0 : index
    %c0_15 = arith.constant 0 : index
    %15 = vector.load %arg6[%c0_14, %c0_15] : memref<1x128xf32, #tpu.memory_space<vmem>>, vector<1x128xf32>
    %16 = vector.broadcast %15 : vector<1x128xf32> to vector<8x128xf32>
    %17 = arith.addf %14, %16 : vector<8x128xf32>
    %c0_16 = arith.constant 0 : index
    %c0_17 = arith.constant 0 : index
    %18 = vector.load %arg7[%c0_16, %c0_17] : memref<128x128xf32, #tpu.memory_space<vmem>>, vector<128x128xf32>
    %cst_18 = arith.constant dense<0.000000e+00> : vector<8x128xf32>
    %19 = tpu.matmul %17, %18, %cst_18 {dimension_numbers = #tpu.dot_dimension_numbers<[1], [0], [0], [1], [0, 0, 1, 1], [], []>} : vector<8x128xf32>, vector<128x128xf32>, vector<8x128xf32> -> vector<8x128xf32>
    %20 = arith.addf %17, %19 : vector<8x128xf32>
    %c0_19 = arith.constant 0 : index
    %c0_20 = arith.constant 0 : index
    %21 = vector.load %arg8[%c0_19, %c0_20] : memref<1x128xf32, #tpu.memory_space<vmem>>, vector<1x128xf32>
    %22 = vector.broadcast %21 : vector<1x128xf32> to vector<8x128xf32>
    %23 = arith.addf %20, %22 : vector<8x128xf32>
    %c0_21 = arith.constant 0 : index
    %c0_22 = arith.constant 0 : index
    %24 = vector.load %arg10[%c0_21, %c0_22] : memref<8x128xf32, #tpu.memory_space<vmem>>, vector<8x128xf32>
    tpu.vector_store %arg10[%c0_21, %c0_22], %23 {strides = array<i32>} : memref<8x128xf32, #tpu.memory_space<vmem>>, vector<8x128xf32>,
    return
  }
  func.func @transform_0(%arg0: i32) -> (i32, i32) {
    %c0_i32 = arith.constant 0 : i32
    %c0_i32_0 = arith.constant 0 : i32
    return %arg0, %c0_i32 : i32, i32
  }
  func.func @transform_1(%arg0: i32) -> (i32, i32) {
    %c0_i32 = arith.constant 0 : i32
    %c0_i32_0 = arith.constant 0 : i32
    %c0_i32_1 = arith.constant 0 : i32
    return %c0_i32, %c0_i32_0 : i32, i32
  }
  func.func @transform_2(%arg0: i32) -> (i32, i32) {
    %c0_i32 = arith.constant 0 : i32
    %c0_i32_0 = arith.constant 0 : i32
    %c0_i32_1 = arith.constant 0 : i32
    return %c0_i32, %c0_i32_0 : i32, i32
  }
  func.func @transform_3(%arg0: i32) -> (i32, i32) {
    %c0_i32 = arith.constant 0 : i32
    %c0_i32_0 = arith.constant 0 : i32
    %c0_i32_1 = arith.constant 0 : i32
    return %c0_i32, %c0_i32_0 : i32, i32
  }
  func.func @transform_4(%arg0: i32) -> (i32, i32) {
    %c0_i32 = arith.constant 0 : i32
    %c0_i32_0 = arith.constant 0 : i32
    %c0_i32_1 = arith.constant 0 : i32
    return %c0_i32, %c0_i32_0 : i32, i32
  }
  func.func @transform_5(%arg0: i32) -> (i32, i32) {
    %c0_i32 = arith.constant 0 : i32
    %c0_i32_0 = arith.constant 0 : i32
    %c0_i32_1 = arith.constant 0 : i32
    return %c0_i32, %c0_i32_0 : i32, i32
  }
  func.func @transform_6(%arg0: i32) -> (i32, i32) {
    %c0_i32 = arith.constant 0 : i32
    %c0_i32_0 = arith.constant 0 : i32
    %c0_i32_1 = arith.constant 0 : i32
    return %c0_i32, %c0_i32_0 : i32, i32
  }
  func.func @transform_7(%arg0: i32) -> (i32, i32) {
    %c0_i32 = arith.constant 0 : i32
    %c0_i32_0 = arith.constant 0 : i32
    %c0_i32_1 = arith.constant 0 : i32
    return %c0_i32, %c0_i32_0 : i32, i32
  }
  func.func @transform_8(%arg0: i32) -> (i32, i32) {
    %c0_i32 = arith.constant 0 : i32
    %c0_i32_0 = arith.constant 0 : i32
    return %arg0, %c0_i32 : i32, i32
  }
  func.func @transform_9(%arg0: i32) -> (i32, i32) {
    %c0_i32 = arith.constant 0 : i32
    %c0_i32_0 = arith.constant 0 : i32
    return %arg0, %c0_i32 : i32, i32
  }
}

</mosaic_0001>

<bundles_post_ra>
// kernel: baseline_fc_er_forward.1
= control target key start
LH: loop header
LB: loop body
LE: loop exit
PB: predicated region body
PF: predicated region fallthrough
CT: control target
= control target key end

     0   :  { %15 = vsyncpa [#allocation3], 0  ;;  %s2582_s0 = inlined_call_operand.vmem [shape: f32[8,2048], index: 0, kind: input, shape index: {}]   ;;  %s2583_s1 = inlined_call_operand.hbm [shape: bf16[2048,128], index: 1, kind: input, shape index: {}]   ;;  %s2584_s2 = inlined_call_operand.vmem [shape: f32[1,128], index: 2, kind: input, shape index: {}]   ;;  %s2585_s3 = inlined_call_operand.hbm [shape: f32[128,256], index: 3, kind: input, shape index: {}]   ;;  %s2586_s4 = inlined_call_operand.vmem [shape: bf16[128,128], index: 4, kind: input, shape index: {}]   ;;  %s2587_s5 = inlined_call_operand.vmem [shape: f32[1,128], index: 5, kind: input, shape index: {}]   ;;  %s2588_s6 = inlined_call_operand.vmem [shape: f32[128,128], index: 6, kind: input, shape index: {}]   ;;  %s2589_s7 = inlined_call_operand.vmem [shape: f32[1,128], index: 7, kind: input, shape index: {}]   ;;  %s2590_s8 = inlined_call_operand.vmem [shape: f32[8,256], index: 8, kind: output, shape index: {0}]   ;;  %s2591_s9 = inlined_call_operand.vmem [shape: f32[8,128], index: 9, kind: output, shape index: {1}]  }
   0x1   :  { %16 = vsyncpa [#allocation5], 0  ;;  %s2351_s30 = smov [#allocation2]  }
   0x2   :  { %s24_s10 = sshll.u32 %s2351_s30, 4  ;;  %s25_s10 = int_to_ptr.vmem [resolvable:$true] %s24_s10 }
   0x3   :  { %s2315_s11 = scalar_lea.vmem %s25_s10, 16384  ;;  %p2320_p1 = scmp.lt.s32.totalorder %s25_s10, %s25_s10 }
   0x4   :  { %p2316_p0 = scmp.ne.s32.totalorder %s25_s10, %s2315_s11  ;;  %p2321_p2 = scmp.lt.s32.totalorder %s2315_s11, %s2315_s11 }
   0x6   :  { %p2322_p3 = por %p2321_p2, %p2320_p1 }
   0x8   :  { %p2323_p4 = pnand %p2322_p3, %p2316_p0 }
   0xa   :  { %2326 = shalt.err (!%p2323_p4)
}
   0xb   :  { %s2352_s12 = smov 64   ;;  %s2353_s13 = smov 4  }
   0xc   :  { %30 = dma.hbm_to_vmem [thread:$0]  %s2583_s1, 16384, %s25_s10, [#allocation3], %s2352_s12, %s2352_s12, %s2353_s13  }
   0xd   :  { %s2354_s16 = smov [#allocation4]  }
   0xe   :  { %s38_s17 = sshll.u32 %s2354_s16, 4  ;;  %s39_s17 = int_to_ptr.vmem [resolvable:$true] %s38_s17 }
   0xf   :  { %s2335_s18 = scalar_lea.vmem %s39_s17, 4096  ;;  %p2340_p6 = scmp.lt.s32.totalorder %s39_s17, %s39_s17 }
  0x10   :  { %p2336_p5 = scmp.ne.s32.totalorder %s39_s17, %s2335_s18  ;;  %p2341_p7 = scmp.lt.s32.totalorder %s2335_s18, %s2335_s18 }
  0x12   :  { %p2342_p8 = por %p2341_p7, %p2340_p6 }
  0x14   :  { %p2343_p9 = pnand %p2342_p8, %p2336_p5 }
  0x16   :  { %2346 = shalt.err (!%p2343_p9)
}
  0x17   :  { %s2355_s19 = smov 256   ;;  %s2356_s20 = smov 16  }
  0x18   :  { %44 = dma.hbm_to_vmem [thread:$0]  %s2585_s3, 4096, %s39_s17, [#allocation5], %s2355_s19, %s2355_s19, %s2356_s20  }
  0x19   :  { %2347 = dma.done.wait [#allocation3], 16384  }
  0x1a   :  { %2348 = vsyncadd [#allocation3], 4294950912 }
  0x1b   :  { %2349 = dma.done.wait [#allocation5], 4096  }
  0x1c   :  { %2350 = vsyncadd [#allocation5], 4294963200  ;;  %v2171_v0 = vld [vmem:[#allocation2 + $0x78] sm:$0xff]   ;;  %v2175_v4 = vld [vmem:[#allocation2 + $0x70] sm:$0xff]   ;;  %vm2358_vm0 = vmmov 0  }
  0x1d   :  { %v2172_v1 = vld [vmem:[#allocation2 + $0xf8] sm:$0xff]   ;;  %1906 = vmatprep.subr.bf16.mxu0 %v2171_v0  ;;  %v2176_v5 = vld [vmem:[#allocation2 + $0xf0] sm:$0xff]   ;;  %v2179_v8 = vld [vmem:[#allocation2 + $0x68] sm:$0xff]  }
  0x1e   :  { %v2173_v2 = vld [vmem:[#allocation2 + $0x38] sm:$0xff]   ;;  %1928 = vmatprep.subr.bf16.mxu1 %v2172_v1  ;;  %v2177_v6 = vld [vmem:[#allocation2 + $0x30] sm:$0xff]   ;;  %v2180_v9 = vld [vmem:[#allocation2 + $0xe8] sm:$0xff]  }
  0x1f   :  { %v2174_v3 = vld [vmem:[#allocation2 + $0xb8] sm:$0xff]   ;;  %1907 = vmatpush3.bf16.msra.mxu0 %v2173_v2  ;;  %v2178_v7 = vld [vmem:[#allocation2 + $0xb0] sm:$0xff]   ;;  %v2181_v10 = vld [vmem:[#allocation2 + $0x28] sm:$0xff]  }
  0x20   :  { %1929 = vmatpush3.bf16.msra.mxu1 %v2174_v3  ;;  %1908 = vmatprep.subr.bf16.mxu0 %v2175_v4  ;;  %v2182_v11 = vld [vmem:[#allocation2 + $0xa8] sm:$0xff]   ;;  %v2183_v12 = vld [vmem:[#allocation2 + $0x60] sm:$0xff]   ;;  %v2187_v16 = vld [vmem:[#allocation2 + $0x58] sm:$0xff]  }
  0x21   :  { %1930 = vmatprep.subr.bf16.mxu1 %v2176_v5  ;;  %v2184_v13 = vld [vmem:[#allocation2 + $0xe0] sm:$0xff]   ;;  %v2188_v17 = vld [vmem:[#allocation2 + $0xd8] sm:$0xff]   ;;  %v2191_v20 = vld [vmem:[#allocation2 + $0x50] sm:$0xff]  }
  0x22   :  { %v2185_v14 = vld [vmem:[#allocation2 + $0x20] sm:$0xff]   ;;  %v2189_v18 = vld [vmem:[#allocation2 + $0x18] sm:$0xff]   ;;  %v2192_v21 = vld [vmem:[#allocation2 + $0xd0] sm:$0xff]  }
  0x23   :  { %1909 = vmatpush3.bf16.msra.mxu0 %v2177_v6  ;;  %v2186_v15 = vld [vmem:[#allocation2 + $0xa0] sm:$0xff]   ;;  %v2190_v19 = vld [vmem:[#allocation2 + $0x98] sm:$0xff]   ;;  %v2193_v22 = vld [vmem:[#allocation2 + $0x10] sm:$0xff]  }
  0x24   :  { %1931 = vmatpush3.bf16.msra.mxu1 %v2178_v7  ;;  %1910 = vmatprep.subr.bf16.mxu0 %v2179_v8  ;;  %v2194_v23 = vld [vmem:[#allocation2 + $0x90] sm:$0xff]   ;;  %v2195_v24 = vld [vmem:[#allocation2 + $0x48] sm:$0xff]   ;;  %v2199_v28 = vld [vmem:[#allocation2 + $0x40] sm:$0xff]  }
  0x25   :  { %1932 = vmatprep.subr.bf16.mxu1 %v2180_v9  ;;  %v2196_v25 = vld [vmem:[#allocation2 + $0xc8] sm:$0xff]   ;;  %v2200_v29 = vld [vmem:[#allocation2 + $0xc0] sm:$0xff]   ;;  %v63_v33 = vld [vmem:[%s2582_s0 + $0x18] sm:$0xff] }
  0x26   :  { %v2197_v26 = vld [vmem:[#allocation2 + $0x8] sm:$0xff]   ;;  %v2201_v30 = vld [vmem:[#allocation2] sm:$0xff]   ;;  %v79_v36 = vpack.c.bf16 %v63_v33, %v63_v33  ;;  %v62_v38 = vld [vmem:[%s2582_s0 + $0x10] sm:$0xff] }
  0x27   :  { %1911 = vmatpush3.bf16.msra.mxu0 %v2181_v10  ;;  %v2198_v27 = vld [vmem:[#allocation2 + $0x88] sm:$0xff]   ;;  %v2202_v31 = vld [vmem:[#allocation2 + $0x80] sm:$0xff]   ;;  %v78_v39 = vpack.c.bf16 %v62_v38, %v62_v38  ;;  %v2203_v40 = vld [vmem:[#allocation2 + $0x178] sm:$0xff]  }
  0x28   :  { %1933 = vmatpush3.bf16.msra.mxu1 %v2182_v11  ;;  %1912 = vmatprep.subr.bf16.mxu0 %v2183_v12  ;;  %v61_v32 = vld [vmem:[%s2582_s0 + $0x8] sm:$0xff]  ;;  %v60_v34 = vld [vmem:[%s2582_s0] sm:$0xff]  ;;  %v2204_v41 = vld [vmem:[#allocation2 + $0x1f8] sm:$0xff]  }
  0x29   :  { %1934 = vmatprep.subr.bf16.mxu1 %v2184_v13  ;;  %v77_v35 = vpack.c.bf16 %v61_v32, %v61_v32  ;;  %v76_v37 = vpack.c.bf16 %v60_v34, %v60_v34  ;;  %1195 = vmatprep.mubr.bf16.mxu1 %v79_v36  ;;  %v2205_v42 = vld [vmem:[#allocation2 + $0x138] sm:$0xff]   ;;  %v2207_v44 = vld [vmem:[#allocation2 + $0x170] sm:$0xff]   ;;  %v2211_v48 = vld [vmem:[#allocation2 + $0x168] sm:$0xff]  }
  0x2a   :  { %v2206_v43 = vld [vmem:[#allocation2 + $0x1b8] sm:$0xff]   ;;  %v2208_v45 = vld [vmem:[#allocation2 + $0x1f0] sm:$0xff]   ;;  %v2212_v49 = vld [vmem:[#allocation2 + $0x1e8] sm:$0xff]  }
  0x2b   :  { %1913 = vmatpush3.bf16.msra.mxu0 %v2185_v14  ;;  %1155 = vmatprep.mubr.bf16.mxu0 %v77_v35  ;;  %v2209_v46 = vld [vmem:[#allocation2 + $0x130] sm:$0xff]   ;;  %v2213_v50 = vld [vmem:[#allocation2 + $0x128] sm:$0xff]   ;;  %v2215_v52 = vld [vmem:[#allocation2 + $0x160] sm:$0xff]  }
  0x2c   :  { %1935 = vmatpush3.bf16.msra.mxu1 %v2186_v15  ;;  %1914 = vmatprep.subr.bf16.mxu0 %v2187_v16  ;;  %v2210_v47 = vld [vmem:[#allocation2 + $0x1b0] sm:$0xff]   ;;  %v2214_v51 = vld [vmem:[#allocation2 + $0x1a8] sm:$0xff]   ;;  %v2216_v53 = vld [vmem:[#allocation2 + $0x1e0] sm:$0xff]  }
  0x2d   :  { %1936 = vmatprep.subr.bf16.mxu1 %v2188_v17  ;;  %v2217_v54 = vld [vmem:[#allocation2 + $0x120] sm:$0xff]   ;;  %v2219_v56 = vld [vmem:[#allocation2 + $0x158] sm:$0xff]   ;;  %v2223_v60 = vld [vmem:[#allocation2 + $0x150] sm:$0xff]  }
  0x2e   :  { %v2218_v55 = vld [vmem:[#allocation2 + $0x1a0] sm:$0xff]   ;;  %v2220_v57 = vld [vmem:[#allocation2 + $0x1d8] sm:$0xff]   ;;  %v2224_v61 = vld [vmem:[#allocation2 + $0x1d0] sm:$0xff]  }
  0x2f   :  { %1915 = vmatpush3.bf16.msra.mxu0 %v2189_v18  ;;  %v2221_v58 = vld [vmem:[#allocation2 + $0x118] sm:$0xff]   ;;  %v2225_v62 = vld [vmem:[#allocation2 + $0x110] sm:$0xff]   ;;  %v2227_v0 = vld [vmem:[#allocation2 + $0x148] sm:$0xff]  }
  0x30   :  { %1937 = vmatpush3.bf16.msra.mxu1 %v2190_v19  ;;  %1916 = vmatprep.subr.bf16.mxu0 %v2191_v20  ;;  %v2222_v59 = vld [vmem:[#allocation2 + $0x198] sm:$0xff]   ;;  %v2226_v63 = vld [vmem:[#allocation2 + $0x190] sm:$0xff]   ;;  %v2228_v1 = vld [vmem:[#allocation2 + $0x1c8] sm:$0xff]  }
  0x31   :  { %1938 = vmatprep.subr.bf16.mxu1 %v2192_v21  ;;  %v2229_v2 = vld [vmem:[#allocation2 + $0x108] sm:$0xff]   ;;  %v2231_v4 = vld [vmem:[#allocation2 + $0x140] sm:$0xff]   ;;  %v67_v9 = vld [vmem:[%s2582_s0 + $0x38] sm:$0xff] }
  0x32   :  { %v2230_v3 = vld [vmem:[#allocation2 + $0x188] sm:$0xff]   ;;  %v2232_v5 = vld [vmem:[#allocation2 + $0x1c0] sm:$0xff]   ;;  %v83_v11 = vpack.c.bf16 %v67_v9, %v67_v9  ;;  %v66_v13 = vld [vmem:[%s2582_s0 + $0x30] sm:$0xff] }
  0x33   :  { %1917 = vmatpush3.bf16.msra.mxu0 %v2193_v22  ;;  %v2233_v6 = vld [vmem:[#allocation2 + $0x100] sm:$0xff]   ;;  %v65_v8 = vld [vmem:[%s2582_s0 + $0x28] sm:$0xff]  ;;  %v82_v15 = vpack.c.bf16 %v66_v13, %v66_v13  ;;  %v2235_v16 = vld [vmem:[#allocation2 + $0x278] sm:$0xff]  }
  0x34   :  { %1939 = vmatpush3.bf16.msra.mxu1 %v2194_v23  ;;  %1918 = vmatprep.subr.bf16.mxu0 %v2195_v24  ;;  %v2234_v7 = vld [vmem:[#allocation2 + $0x180] sm:$0xff]   ;;  %v81_v10 = vpack.c.bf16 %v65_v8, %v65_v8  ;;  %v2236_v17 = vld [vmem:[#allocation2 + $0x2f8] sm:$0xff]   ;;  %v2239_v20 = vld [vmem:[#allocation2 + $0x270] sm:$0xff]  }
  0x35   :  { %1940 = vmatprep.subr.bf16.mxu1 %v2196_v25  ;;  %v64_v12 = vld [vmem:[%s2582_s0 + $0x20] sm:$0xff]  ;;  %v2237_v18 = vld [vmem:[#allocation2 + $0x238] sm:$0xff]   ;;  %v2240_v21 = vld [vmem:[#allocation2 + $0x2f0] sm:$0xff]  }
  0x36   :  { %v80_v14 = vpack.c.bf16 %v64_v12, %v64_v12  ;;  %v2238_v19 = vld [vmem:[#allocation2 + $0x2b8] sm:$0xff]   ;;  %v2241_v22 = vld [vmem:[#allocation2 + $0x230] sm:$0xff]   ;;  %v2243_v24 = vld [vmem:[#allocation2 + $0x268] sm:$0xff]  }
  0x37   :  { %1919 = vmatpush3.bf16.msra.mxu0 %v2197_v26  ;;  %v2242_v23 = vld [vmem:[#allocation2 + $0x2b0] sm:$0xff]   ;;  %v2244_v25 = vld [vmem:[#allocation2 + $0x2e8] sm:$0xff]   ;;  %v2251_v32 = vld [vmem:[#allocation2 + $0x258] sm:$0xff]  }
  0x38   :  { %1941 = vmatpush3.bf16.msra.mxu1 %v2198_v27  ;;  %1920 = vmatprep.subr.bf16.mxu0 %v2199_v28  ;;  %v2245_v26 = vld [vmem:[#allocation2 + $0x228] sm:$0xff]   ;;  %v2247_v28 = vld [vmem:[#allocation2 + $0x260] sm:$0xff]   ;;  %v2252_v33 = vld [vmem:[#allocation2 + $0x2d8] sm:$0xff]  }
  0x39   :  { %1942 = vmatprep.subr.bf16.mxu1 %v2200_v29  ;;  %v2246_v27 = vld [vmem:[#allocation2 + $0x2a8] sm:$0xff]   ;;  %v2248_v29 = vld [vmem:[#allocation2 + $0x2e0] sm:$0xff]   ;;  %v2253_v34 = vld [vmem:[#allocation2 + $0x218] sm:$0xff]  }
  0x3a   :  { %v2254_v35 = vld [vmem:[#allocation2 + $0x298] sm:$0xff]   ;;  %v2255_v36 = vld [vmem:[#allocation2 + $0x250] sm:$0xff]  }
  0x3b   :  { %1921 = vmatpush3.bf16.msra.mxu0 %v2201_v30  ;;  %v2249_v30 = vld [vmem:[#allocation2 + $0x220] sm:$0xff]   ;;  %v2257_v38 = vld [vmem:[#allocation2 + $0x210] sm:$0xff]   ;;  %v2283_v8 = vld [vmem:[#allocation2 + $0x358] sm:$0xff]  }
  0x3c   :  { %1943 = vmatpush3.bf16.msra.mxu1 %v2202_v31  ;;  %1950 = vmatprep.subr.bf16.mxu0 %v2203_v40  ;;  %v2250_v31 = vld [vmem:[#allocation2 + $0x2a0] sm:$0xff]   ;;  %v2259_v40 = vld [vmem:[#allocation2 + $0x248] sm:$0xff]   ;;  %v2284_v9 = vld [vmem:[#allocation2 + $0x3d8] sm:$0xff]  }
  0x3d   :  { %1972 = vmatprep.subr.bf16.mxu1 %v2204_v41  ;;  %v2260_v41 = vld [vmem:[#allocation2 + $0x2c8] sm:$0xff]   ;;  %v2287_v12 = vld [vmem:[#allocation2 + $0x350] sm:$0xff]  }
  0x3e   :  { %1156 = vmatmul.mubr.bf16.vlgmr.msra.gmra.mxu0 %v76_v37  ;;  %v2256_v37 = vld [vmem:[#allocation2 + $0x2d0] sm:$0xff]  }
  0x3f   :  { %1196 = vmatmul.mubr.bf16.vlgmr.msra.gmra.mxu1 %v78_v39  ;;  %1951 = vmatpush3.bf16.msra.mxu0 %v2205_v42  ;;  %v2258_v39 = vld [vmem:[#allocation2 + $0x290] sm:$0xff]   ;;  %v2261_v42 = vld [vmem:[#allocation2 + $0x208] sm:$0xff]  }
  0x40   :  { %1973 = vmatpush3.bf16.msra.mxu1 %v2206_v43  ;;  %1952 = vmatprep.subr.bf16.mxu0 %v2207_v44  ;;  %v2262_v43 = vld [vmem:[#allocation2 + $0x288] sm:$0xff]   ;;  %v2263_v44 = vld [vmem:[#allocation2 + $0x240] sm:$0xff]   ;;  %v2288_v13 = vld [vmem:[#allocation2 + $0x3d0] sm:$0xff]  }
  0x41   :  { %1974 = vmatprep.subr.bf16.mxu1 %v2208_v45  ;;  %1235 = vmatprep.mubr.bf16.mxu0 %v81_v10  ;;  %v2264_v45 = vld [vmem:[#allocation2 + $0x2c0] sm:$0xff]   ;;  %v2285_v10 = vld [vmem:[#allocation2 + $0x318] sm:$0xff]  }
  0x42   :  { %1275 = vmatprep.mubr.bf16.mxu1 %v83_v11  ;;  %v2286_v11 = vld [vmem:[#allocation2 + $0x398] sm:$0xff]  }
  0x43   :  { %1953 = vmatpush3.bf16.msra.mxu0 %v2209_v46  ;;  %v2265_v46 = vld [vmem:[#allocation2 + $0x200] sm:$0xff]  }
  0x44   :  { %1975 = vmatpush3.bf16.msra.mxu1 %v2210_v47  ;;  %1954 = vmatprep.subr.bf16.mxu0 %v2211_v48  ;;  %v2266_v47 = vld [vmem:[#allocation2 + $0x280] sm:$0xff]   ;;  %v69_v48 = vld [vmem:[%s2582_s0 + $0x48] sm:$0xff] }
  0x45   :  { %1976 = vmatprep.subr.bf16.mxu1 %v2212_v49  ;;  %v85_v49 = vpack.c.bf16 %v69_v48, %v69_v48  ;;  %v1462_v48 = vld [vmem:[#allocation4 + $0x98] sm:$0xff] }
  0x47   :  { %1955 = vmatpush3.bf16.msra.mxu0 %v2213_v50  ;;  %v71_v50 = vld [vmem:[%s2582_s0 + $0x58] sm:$0xff] }
  0x48   :  { %1977 = vmatpush3.bf16.msra.mxu1 %v2214_v51  ;;  %1956 = vmatprep.subr.bf16.mxu0 %v2215_v52  ;;  %v68_v51 = vld [vmem:[%s2582_s0 + $0x40] sm:$0xff]  ;;  %v70_v52 = vld [vmem:[%s2582_s0 + $0x50] sm:$0xff] }
  0x49   :  { %1978 = vmatprep.subr.bf16.mxu1 %v2216_v53  ;;  %v87_v53 = vpack.c.bf16 %v71_v50, %v71_v50  ;;  %v1460_v50 = vld [vmem:[#allocation4 + $0x88] sm:$0xff] }
  0x4b   :  { %1957 = vmatpush3.bf16.msra.mxu0 %v2217_v54  ;;  %v84_v54 = vpack.c.bf16 %v68_v51, %v68_v51  ;;  %v2302_v51 = vld [vmem:[%s2586_s4 + $0x20] sm:$0xff]  }
  0x4c   :  { %1979 = vmatpush3.bf16.msra.mxu1 %v2218_v55  ;;  %1958 = vmatprep.subr.bf16.mxu0 %v2219_v56  ;;  %v86_v55 = vpack.c.bf16 %v70_v52, %v70_v52  ;;  %v2267_v56 = vld [vmem:[#allocation2 + $0x378] sm:$0xff]   ;;  %v1459_v52 = vld [vmem:[#allocation4 + $0x80] sm:$0xff] }
  0x4d   :  { %1980 = vmatprep.subr.bf16.mxu1 %v2220_v57  ;;  %v2268_v57 = vld [vmem:[#allocation2 + $0x3f8] sm:$0xff]  }
  0x4f   :  { %1959 = vmatpush3.bf16.msra.mxu0 %v2221_v58  ;;  %v2269_v58 = vld [vmem:[#allocation2 + $0x338] sm:$0xff]  }
  0x50   :  { %1981 = vmatpush3.bf16.msra.mxu1 %v2222_v59  ;;  %1960 = vmatprep.subr.bf16.mxu0 %v2223_v60  ;;  %v2270_v59 = vld [vmem:[#allocation2 + $0x3b8] sm:$0xff]   ;;  %v2271_v60 = vld [vmem:[#allocation2 + $0x370] sm:$0xff]  }
  0x51   :  { %1982 = vmatprep.subr.bf16.mxu1 %v2224_v61  ;;  %v2272_v61 = vld [vmem:[#allocation2 + $0x3f0] sm:$0xff]  }
  0x53   :  { %1961 = vmatpush3.bf16.msra.mxu0 %v2225_v62  ;;  %v2273_v62 = vld [vmem:[#allocation2 + $0x330] sm:$0xff]  }
  0x54   :  { %1983 = vmatpush3.bf16.msra.mxu1 %v2226_v63  ;;  %1962 = vmatprep.subr.bf16.mxu0 %v2227_v0  ;;  %v2274_v63 = vld [vmem:[#allocation2 + $0x3b0] sm:$0xff]   ;;  %v2275_v0 = vld [vmem:[#allocation2 + $0x368] sm:$0xff]  }
  0x55   :  { %1984 = vmatprep.subr.bf16.mxu1 %v2228_v1  ;;  %v2276_v1 = vld [vmem:[#allocation2 + $0x3e8] sm:$0xff]  }
  0x57   :  { %1963 = vmatpush3.bf16.msra.mxu0 %v2229_v2  ;;  %v2277_v2 = vld [vmem:[#allocation2 + $0x328] sm:$0xff]  }
  0x58   :  { %1985 = vmatpush3.bf16.msra.mxu1 %v2230_v3  ;;  %1964 = vmatprep.subr.bf16.mxu0 %v2231_v4  ;;  %v2278_v3 = vld [vmem:[#allocation2 + $0x3a8] sm:$0xff]   ;;  %v2279_v4 = vld [vmem:[#allocation2 + $0x360] sm:$0xff]  }
  0x59   :  { %1986 = vmatprep.subr.bf16.mxu1 %v2232_v5  ;;  %v2280_v5 = vld [vmem:[#allocation2 + $0x3e0] sm:$0xff]  }
  0x5b   :  { %1965 = vmatpush3.bf16.msra.mxu0 %v2233_v6  ;;  %v2281_v6 = vld [vmem:[#allocation2 + $0x320] sm:$0xff]  }
  0x5c   :  { %1987 = vmatpush3.bf16.msra.mxu1 %v2234_v7  ;;  %1994 = vmatprep.subr.bf16.mxu0 %v2235_v16  ;;  %v2282_v7 = vld [vmem:[#allocation2 + $0x3a0] sm:$0xff]   ;;  %v2291_v16 = vld [vmem:[#allocation2 + $0x348] sm:$0xff]  }
  0x5d   :  { %2016 = vmatprep.subr.bf16.mxu1 %v2236_v17  ;;  %v2292_v17 = vld [vmem:[#allocation2 + $0x3c8] sm:$0xff]  }
  0x5e   :  { %1236 = vmatmul.mubr.bf16.vlgmr.msra.gmra.mxu0 %v80_v14  ;;  %v2289_v14 = vld [vmem:[#allocation2 + $0x310] sm:$0xff]  }
  0x5f   :  { %1276 = vmatmul.mubr.bf16.vlgmr.msra.gmra.mxu1 %v82_v15  ;;  %1995 = vmatpush3.bf16.msra.mxu0 %v2237_v18  ;;  %v2290_v15 = vld [vmem:[#allocation2 + $0x390] sm:$0xff]   ;;  %v2293_v18 = vld [vmem:[#allocation2 + $0x308] sm:$0xff]  }
  0x60   :  { %2017 = vmatpush3.bf16.msra.mxu1 %v2238_v19  ;;  %1996 = vmatprep.subr.bf16.mxu0 %v2239_v20  ;;  %v2294_v19 = vld [vmem:[#allocation2 + $0x388] sm:$0xff]   ;;  %v2295_v20 = vld [vmem:[#allocation2 + $0x340] sm:$0xff]  }
  0x61   :  { %2018 = vmatprep.subr.bf16.mxu1 %v2240_v21  ;;  %1315 = vmatprep.mubr.bf16.mxu0 %v85_v49  ;;  %v2296_v21 = vld [vmem:[#allocation2 + $0x3c0] sm:$0xff]   ;;  %v1461_v49 = vld [vmem:[#allocation4 + $0x90] sm:$0xff] }
  0x62   :  { %1355 = vmatprep.mubr.bf16.mxu1 %v87_v53  ;;  %v1458_v53 = vld [vmem:[#allocation4 + $0x78] sm:$0xff] }
  0x63   :  { %1997 = vmatpush3.bf16.msra.mxu0 %v2241_v22  ;;  %v2297_v22 = vld [vmem:[#allocation2 + $0x300] sm:$0xff]  }
  0x64   :  { %2019 = vmatpush3.bf16.msra.mxu1 %v2242_v23  ;;  %1998 = vmatprep.subr.bf16.mxu0 %v2243_v24  ;;  %v2298_v23 = vld [vmem:[#allocation2 + $0x380] sm:$0xff]   ;;  %v73_v24 = vld [vmem:[%s2582_s0 + $0x68] sm:$0xff] }
  0x65   :  { %2020 = vmatprep.subr.bf16.mxu1 %v2244_v25  ;;  %v75_v25 = vld [vmem:[%s2582_s0 + $0x78] sm:$0xff] }
  0x67   :  { %1999 = vmatpush3.bf16.msra.mxu0 %v2245_v26  ;;  %v72_v26 = vld [vmem:[%s2582_s0 + $0x60] sm:$0xff] }
  0x68   :  { %2021 = vmatpush3.bf16.msra.mxu1 %v2246_v27  ;;  %2000 = vmatprep.subr.bf16.mxu0 %v2247_v28  ;;  %v89_v27 = vpack.c.bf16 %v73_v24, %v73_v24  ;;  %v91_v28 = vpack.c.bf16 %v75_v25, %v75_v25 }
  0x69   :  { %2022 = vmatprep.subr.bf16.mxu1 %v2248_v29  ;;  %v88_v29 = vpack.c.bf16 %v72_v26, %v72_v26 }
  0x6b   :  { %2001 = vmatpush3.bf16.msra.mxu0 %v2249_v30  ;;  %v74_v30 = vld [vmem:[%s2582_s0 + $0x70] sm:$0xff] }
  0x6c   :  { %2023 = vmatpush3.bf16.msra.mxu1 %v2250_v31  ;;  %2002 = vmatprep.subr.bf16.mxu0 %v2251_v32  ;;  %v90_v31 = vpack.c.bf16 %v74_v30, %v74_v30  ;;  %v1474_v32 = vld [vmem:[#allocation4 + $0xf8] sm:$0xff] }
  0x6d   :  { %2024 = vmatprep.subr.bf16.mxu1 %v2252_v33  ;;  %v1473_v33 = vld [vmem:[#allocation4 + $0xf0] sm:$0xff] }
  0x6f   :  { %2003 = vmatpush3.bf16.msra.mxu0 %v2253_v34  ;;  %v1472_v34 = vld [vmem:[#allocation4 + $0xe8] sm:$0xff] }
  0x70   :  { %2025 = vmatpush3.bf16.msra.mxu1 %v2254_v35  ;;  %2004 = vmatprep.subr.bf16.mxu0 %v2255_v36  ;;  %v1471_v35 = vld [vmem:[#allocation4 + $0xe0] sm:$0xff]  ;;  %v2357_v36 = vmov 0.0  }
  0x71   :  { %2026 = vmatprep.subr.bf16.mxu1 %v2256_v37  ;;  %v1470_v37 = vld [vmem:[#allocation4 + $0xd8] sm:$0xff] }
  0x73   :  { %2005 = vmatpush3.bf16.msra.mxu0 %v2257_v38  ;;  %v2299_v38 = vld [vmem:[%s2586_s4 + $0x38] sm:$0xff]  }
  0x74   :  { %2027 = vmatpush3.bf16.msra.mxu1 %v2258_v39  ;;  %2006 = vmatprep.subr.bf16.mxu0 %v2259_v40  ;;  %v1469_v39 = vld [vmem:[#allocation4 + $0xd0] sm:$0xff]  ;;  %v1468_v40 = vld [vmem:[#allocation4 + $0xc8] sm:$0xff] }
  0x75   :  { %2028 = vmatprep.subr.bf16.mxu1 %v2260_v41  ;;  %v2300_v41 = vld [vmem:[%s2586_s4 + $0x30] sm:$0xff]  }
  0x77   :  { %2007 = vmatpush3.bf16.msra.mxu0 %v2261_v42  ;;  %v1467_v42 = vld [vmem:[#allocation4 + $0xc0] sm:$0xff] }
  0x78   :  { %2029 = vmatpush3.bf16.msra.mxu1 %v2262_v43  ;;  %2008 = vmatprep.subr.bf16.mxu0 %v2263_v44  ;;  %v1466_v43 = vld [vmem:[#allocation4 + $0xb8] sm:$0xff]  ;;  %v1465_v44 = vld [vmem:[#allocation4 + $0xb0] sm:$0xff] }
  0x79   :  { %2030 = vmatprep.subr.bf16.mxu1 %v2264_v45  ;;  %v1464_v45 = vld [vmem:[#allocation4 + $0xa8] sm:$0xff] }
  0x7b   :  { %2009 = vmatpush3.bf16.msra.mxu0 %v2265_v46  ;;  %v2301_v46 = vld [vmem:[%s2586_s4 + $0x28] sm:$0xff]  }
  0x7c   :  { %2031 = vmatpush3.bf16.msra.mxu1 %v2266_v47  ;;  %2038 = vmatprep.subr.bf16.mxu0 %v2267_v56  ;;  %v1463_v47 = vld [vmem:[#allocation4 + $0xa0] sm:$0xff]  ;;  %v2303_v56 = vld [vmem:[%s2586_s4 + $0x18] sm:$0xff]  }
  0x7d   :  { %2060 = vmatprep.subr.bf16.mxu1 %v2268_v57  ;;  %v1455_v57 = vld [vmem:[#allocation4 + $0x60] sm:$0xff] }
  0x7e   :  { %1316 = vmatmul.mubr.bf16.vlgmr.msra.gmra.mxu0 %v84_v54  ;;  %v1457_v54 = vld [vmem:[#allocation4 + $0x70] sm:$0xff] }
  0x7f   :  { %1356 = vmatmul.mubr.bf16.vlgmr.msra.gmra.mxu1 %v86_v55  ;;  %2039 = vmatpush3.bf16.msra.mxu0 %v2269_v58  ;;  %v1456_v55 = vld [vmem:[#allocation4 + $0x68] sm:$0xff]  ;;  %v1454_v58 = vld [vmem:[#allocation4 + $0x58] sm:$0xff] }
  0x80   :  { %2061 = vmatpush3.bf16.msra.mxu1 %v2270_v59  ;;  %2040 = vmatprep.subr.bf16.mxu0 %v2271_v60  ;;  %v1453_v59 = vld [vmem:[#allocation4 + $0x50] sm:$0xff]  ;;  %v1452_v60 = vld [vmem:[#allocation4 + $0x48] sm:$0xff] }
  0x81   :  { %2062 = vmatprep.subr.bf16.mxu1 %v2272_v61  ;;  %1395 = vmatprep.mubr.bf16.mxu0 %v89_v27  ;;  %v1451_v61 = vld [vmem:[#allocation4 + $0x40] sm:$0xff] }
  0x82   :  { %1435 = vmatprep.mubr.bf16.mxu1 %v91_v28 }
  0x83   :  { %2041 = vmatpush3.bf16.msra.mxu0 %v2273_v62  ;;  %v1450_v62 = vld [vmem:[#allocation4 + $0x38] sm:$0xff] }
  0x84   :  { %2063 = vmatpush3.bf16.msra.mxu1 %v2274_v63  ;;  %2042 = vmatprep.subr.bf16.mxu0 %v2275_v0  ;;  %v2304_v63 = vld [vmem:[%s2586_s4 + $0x10] sm:$0xff]  }
  0x85   :  { %2064 = vmatprep.subr.bf16.mxu1 %v2276_v1  ;;  %v1449_v0 = vld [vmem:[#allocation4 + $0x30] sm:$0xff]  ;;  %v1448_v1 = vld [vmem:[#allocation4 + $0x28] sm:$0xff] }
  0x87   :  { %2043 = vmatpush3.bf16.msra.mxu0 %v2277_v2  ;;  %v1447_v2 = vld [vmem:[#allocation4 + $0x20] sm:$0xff] }
  0x88   :  { %2065 = vmatpush3.bf16.msra.mxu1 %v2278_v3  ;;  %2044 = vmatprep.subr.bf16.mxu0 %v2279_v4  ;;  %v1446_v3 = vld [vmem:[#allocation4 + $0x18] sm:$0xff]  ;;  %v2305_v4 = vld [vmem:[%s2586_s4 + $0x8] sm:$0xff]  }
  0x89   :  { %2066 = vmatprep.subr.bf16.mxu1 %v2280_v5  ;;  %v1445_v5 = vld [vmem:[#allocation4 + $0x10] sm:$0xff] }
  0x8b   :  { %2045 = vmatpush3.bf16.msra.mxu0 %v2281_v6  ;;  %v1444_v6 = vld [vmem:[#allocation4 + $0x8] sm:$0xff] }
  0x8c   :  { %2067 = vmatpush3.bf16.msra.mxu1 %v2282_v7  ;;  %2046 = vmatprep.subr.bf16.mxu0 %v2283_v8  ;;  %v1443_v7 = vld [vmem:[#allocation4] sm:$0xff] }
  0x8d   :  { %2068 = vmatprep.subr.bf16.mxu1 %v2284_v9  ;;  %v2306_v8 = vld [vmem:[%s2586_s4] sm:$0xff]  }
  0x8f   :  { %2047 = vmatpush3.bf16.msra.mxu0 %v2285_v10 }
  0x90   :  { %2069 = vmatpush3.bf16.msra.mxu1 %v2286_v11  ;;  %2048 = vmatprep.subr.bf16.mxu0 %v2287_v12  ;;  %v1767_v11 = vld [vmem:[%s2584_s2] ss:$0 sm:$0xff] }
  0x91   :  { %2070 = vmatprep.subr.bf16.mxu1 %v2288_v13 }
  0x93   :  { %2049 = vmatpush3.bf16.msra.mxu0 %v2289_v14 }
  0x94   :  { %2071 = vmatpush3.bf16.msra.mxu1 %v2290_v15  ;;  %2050 = vmatprep.subr.bf16.mxu0 %v2291_v16 }
  0x95   :  { %2072 = vmatprep.subr.bf16.mxu1 %v2292_v17 }
  0x97   :  { %2051 = vmatpush3.bf16.msra.mxu0 %v2293_v18 }
  0x98   :  { %2073 = vmatpush3.bf16.msra.mxu1 %v2294_v19  ;;  %2052 = vmatprep.subr.bf16.mxu0 %v2295_v20 }
  0x99   :  { %2074 = vmatprep.subr.bf16.mxu1 %v2296_v21 }
  0x9b   :  { %2053 = vmatpush3.bf16.msra.mxu0 %v2297_v22 }
  0x9c   :  { %2075 = vmatpush3.bf16.msra.mxu1 %v2298_v23  ;;  %1475 = vmatprep.subr.mxu0 %v1474_v32 }
  0x9d   :  { %2108 = vmatprep.subr.bf16.mxu1 %v2357_v36 }
  0x9e   :  { %1396 = vmatmul.mubr.bf16.vlgmr.msra.gmra.mxu0 %v88_v29 }
  0x9f   :  { %1436 = vmatmul.mubr.bf16.vlgmr.msra.gmra.mxu1 %v90_v31  ;;  %1476 = vmatpush1.msra.mxu0 %v1473_v33 }
  0xa0   :  { %1539 = vmatprep.mubr.f32.mxu0 %v2357_v36  ;;  %1477 = vmatprep.subr.mxu0 %v1472_v34 }
  0xa1   :  { %1478 = vmatpush1.msra.mxu0 %v1471_v35  ;;  %2109 = vmatpush3.bf16.msra.mxu1 %v2299_v38 }
  0xa2   :  { %1479 = vmatprep.subr.mxu0 %v1470_v37  ;;  %2110 = vmatprep.subr.bf16.mxu1 %v2357_v36 }
  0xa3   :  { %1480 = vmatpush1.msra.mxu0 %v1469_v39  ;;  %2124 = vmatprep.mubr.msk.bf16.mxu1 %vm2358_vm0, %v2357_v36 }
  0xa4   :  { %1481 = vmatprep.subr.mxu0 %v1468_v40 }
  0xa5   :  { %1482 = vmatpush1.msra.mxu0 %v1467_v42  ;;  %2111 = vmatpush3.bf16.msra.mxu1 %v2300_v41 }
  0xa6   :  { %1483 = vmatprep.subr.mxu0 %v1466_v43  ;;  %2112 = vmatprep.subr.bf16.mxu1 %v2357_v36 }
  0xa7   :  { %1484 = vmatpush1.msra.mxu0 %v1465_v44 }
  0xa8   :  { %1485 = vmatprep.subr.mxu0 %v1464_v45 }
  0xa9   :  { %1486 = vmatpush1.msra.mxu0 %v1463_v47  ;;  %2113 = vmatpush3.bf16.msra.mxu1 %v2301_v46 }
  0xaa   :  { %1487 = vmatprep.subr.mxu0 %v1462_v48  ;;  %2114 = vmatprep.subr.bf16.mxu1 %v2357_v36 }
  0xab   :  { %1488 = vmatpush1.msra.mxu0 %v1461_v49 }
  0xac   :  { %1489 = vmatprep.subr.mxu0 %v1460_v50 }
  0xad   :  { %1490 = vmatpush1.msra.mxu0 %v1459_v52  ;;  %2115 = vmatpush3.bf16.msra.mxu1 %v2302_v51 }
  0xae   :  { %1491 = vmatprep.subr.mxu0 %v1458_v53  ;;  %2116 = vmatprep.subr.bf16.mxu1 %v2357_v36 }
  0xaf   :  { %1492 = vmatpush1.msra.mxu0 %v1457_v54 }
  0xb0   :  { %1493 = vmatprep.subr.mxu0 %v1456_v55 }
  0xb1   :  { %1494 = vmatpush1.msra.mxu0 %v1455_v57  ;;  %2117 = vmatpush3.bf16.msra.mxu1 %v2303_v56 }
  0xb2   :  { %1495 = vmatprep.subr.mxu0 %v1454_v58  ;;  %2118 = vmatprep.subr.bf16.mxu1 %v2357_v36 }
  0xb3   :  { %1496 = vmatpush1.msra.mxu0 %v1453_v59  ;;  %v1676_v59 = vld [vmem:[%s2588_s6 + $0x78] sm:$0xff] }
  0xb4   :  { %1497 = vmatprep.subr.mxu0 %v1452_v60 }
  0xb5   :  { %1498 = vmatpush1.msra.mxu0 %v1451_v61  ;;  %2119 = vmatpush3.bf16.msra.mxu1 %v2304_v63  ;;  %v1675_v61 = vld [vmem:[%s2588_s6 + $0x70] sm:$0xff]  ;;  %v1674_v63 = vld [vmem:[%s2588_s6 + $0x68] sm:$0xff] }
  0xb6   :  { %1499 = vmatprep.subr.mxu0 %v1450_v62  ;;  %2120 = vmatprep.subr.bf16.mxu1 %v2357_v36 }
  0xb7   :  { %1500 = vmatpush1.msra.mxu0 %v1449_v0  ;;  %v1673_v0 = vld [vmem:[%s2588_s6 + $0x60] sm:$0xff] }
  0xb8   :  { %1501 = vmatprep.subr.mxu0 %v1448_v1  ;;  %v1672_v1 = vld [vmem:[%s2588_s6 + $0x58] sm:$0xff] }
  0xb9   :  { %1502 = vmatpush1.msra.mxu0 %v1447_v2  ;;  %2121 = vmatpush3.bf16.msra.mxu1 %v2305_v4  ;;  %v1671_v2 = vld [vmem:[%s2588_s6 + $0x50] sm:$0xff]  ;;  %v1669_v4 = vld [vmem:[%s2588_s6 + $0x40] sm:$0xff] }
  0xba   :  { %1503 = vmatprep.subr.mxu0 %v1446_v3  ;;  %2122 = vmatprep.subr.bf16.mxu1 %v2357_v36  ;;  %v1670_v3 = vld [vmem:[%s2588_s6 + $0x48] sm:$0xff] }
  0xbb   :  { %1504 = vmatpush1.msra.mxu0 %v1445_v5  ;;  %v1668_v5 = vld [vmem:[%s2588_s6 + $0x38] sm:$0xff] }
  0xbc   :  { %1505 = vmatprep.subr.mxu0 %v1444_v6  ;;  %v1667_v6 = vld [vmem:[%s2588_s6 + $0x30] sm:$0xff] }
  0xbd   :  { %1506 = vmatpush1.msra.mxu0 %v1443_v7  ;;  %2123 = vmatpush3.bf16.msra.mxu1 %v2306_v8  ;;  %v1666_v7 = vld [vmem:[%s2588_s6 + $0x28] sm:$0xff]  ;;  %v1665_v8 = vld [vmem:[%s2588_s6 + $0x20] sm:$0xff] }
  0xbe   :  { %2128 = vmatprep.subr.mxu0 %v2357_v36 }
  0xfe   :  { %v1922_v9 = vpop.f32.mrf.mxu0 }
  0xff   :  { %v1944_v10 = vpop.f32.mrf.mxu1 }
 0x100   :  { %v1923_v12 = vpop.f32.mrf.mxu0 }
 0x101   :  { %v1945_v13 = vpop.f32.mrf.mxu1  ;;  %v1924_v14 = vadd.f32 %v1923_v12, %v1922_v9  ;;  %v1664_v9 = vld [vmem:[%s2588_s6 + $0x18] sm:$0xff]  ;;  %v1661_v12 = vld [vmem:[%s2588_s6] sm:$0xff] }
 0x102   :  { %v1946_v15 = vadd.f32 %v1945_v13, %v1944_v10  ;;  %v1925_v16 = vpop.f32.mrf.mxu0  ;;  %v1663_v10 = vld [vmem:[%s2588_s6 + $0x10] sm:$0xff] }
 0x103   :  { %v1947_v17 = vpop.f32.mrf.mxu1  ;;  %v1158_v18 = vadd.f32 %v1924_v14, %v1767_v11  ;;  %v1662_v11 = vld [vmem:[%s2588_s6 + $0x8] sm:$0xff] }
 0x104   :  { %v1926_v19 = vpop.f32.mrf.mxu0 }
 0x105   :  { %v1948_v20 = vpop.f32.mrf.mxu1  ;;  %v1198_v21 = vadd.f32 %v1946_v15, %v1158_v18  ;;  %v1896_v15 = vld [vmem:[%s2587_s5] ss:$0 sm:$0xff] }
 0x11e   :  { %v1966_v22 = vpop.f32.mrf.mxu0 }
 0x11f   :  { %v1988_v23 = vpop.f32.mrf.mxu1 }
 0x120   :  { %v1967_v24 = vpop.f32.mrf.mxu0 }
 0x121   :  { %v1989_v25 = vpop.f32.mrf.mxu1  ;;  %v1968_v39 = vadd.f32 %v1967_v24, %v1966_v22 }
 0x122   :  { %v1969_v26 = vpop.f32.mrf.mxu0  ;;  %v1990_v41 = vadd.f32 %v1989_v25, %v1988_v23 }
 0x123   :  { %v1991_v27 = vpop.f32.mrf.mxu1  ;;  %v1238_v40 = vadd.f32 %v1968_v39, %v1198_v21  ;;  %v1905_v21 = vld [vmem:[%s2589_s7] ss:$0 sm:$0xff] }
 0x124   :  { %v1970_v28 = vpop.f32.mrf.mxu0 }
 0x125   :  { %v1992_v29 = vpop.f32.mrf.mxu1  ;;  %v1278_v43 = vadd.f32 %v1990_v41, %v1238_v40 }
 0x13e   :  { %v2010_v30 = vpop.f32.mrf.mxu0 }
 0x13f   :  { %v2032_v31 = vpop.f32.mrf.mxu1 }
 0x140   :  { %v2011_v32 = vpop.f32.mrf.mxu0 }
 0x141   :  { %v2033_v33 = vpop.f32.mrf.mxu1  ;;  %v2012_v42 = vadd.f32 %v2011_v32, %v2010_v30 }
 0x142   :  { %v2013_v34 = vpop.f32.mrf.mxu0  ;;  %v2034_v45 = vadd.f32 %v2033_v33, %v2032_v31 }
 0x143   :  { %v2035_v35 = vpop.f32.mrf.mxu1  ;;  %v1318_v44 = vadd.f32 %v2012_v42, %v1278_v43 }
 0x144   :  { %v2014_v37 = vpop.f32.mrf.mxu0 }
 0x145   :  { %v2036_v38 = vpop.f32.mrf.mxu1  ;;  %v1358_v50 = vadd.f32 %v2034_v45, %v1318_v44 }
 0x15e   :  { %v2054_v46 = vpop.f32.mrf.mxu0 }
 0x15f   :  { %v2076_v47 = vpop.f32.mrf.mxu1 }
 0x160   :  { %v2055_v48 = vpop.f32.mrf.mxu0 }
 0x161   :  { %v2077_v49 = vpop.f32.mrf.mxu1  ;;  %v2056_v51 = vadd.f32 %v2055_v48, %v2054_v46 }
 0x162   :  { %v2057_v52 = vpop.f32.mrf.mxu0  ;;  %v2078_v55 = vadd.f32 %v2077_v49, %v2076_v47 }
 0x163   :  { %v2079_v53 = vpop.f32.mrf.mxu1  ;;  %v1398_v54 = vadd.f32 %v2056_v51, %v1358_v50 }
 0x164   :  { %v2058_v56 = vpop.f32.mrf.mxu0 }
 0x165   :  { %v2080_v57 = vpop.f32.mrf.mxu1  ;;  %v1438_v58 = vadd.f32 %v2078_v55, %v1398_v54 }
 0x167   :  { %v1548_v60 = vmax.f32 %v1438_v58, 0.0  ;;  %1540 = vmatmul.mubr.f32.vlgmr.msra.gmra.mxu0 %v1438_v58 }
 0x168   :  { %2129 = vmatpush3.msra.mxu0 %v1676_v59  ;;  %2160 = vmatprep.mubr.msk.f32.mxu0 %vm2358_vm0, %v2357_v36 }
 0x169   :  { %v1549_v62 = vpack.c.bf16 %v1548_v60, %v1548_v60  ;;  %2130 = vmatprep.subr.mxu0 %v2357_v36 }
 0x16a   :  { %2131 = vmatpush3.msra.mxu0 %v1675_v61 }
 0x16b   :  { %2125 = vmatmul.mubr.bf16.vlgmr.msra.gmra.mxu1 %v1549_v62  ;;  %2132 = vmatprep.subr.mxu0 %v2357_v36 }
 0x16c   :  { %2133 = vmatpush3.msra.mxu0 %v1674_v63 }
 0x16d   :  { %2134 = vmatprep.subr.mxu0 %v2357_v36 }
 0x16e   :  { %2135 = vmatpush3.msra.mxu0 %v1673_v0 }
 0x16f   :  { %2136 = vmatprep.subr.mxu0 %v2357_v36 }
 0x170   :  { %2137 = vmatpush3.msra.mxu0 %v1672_v1 }
 0x171   :  { %2138 = vmatprep.subr.mxu0 %v2357_v36 }
 0x172   :  { %2139 = vmatpush3.msra.mxu0 %v1671_v2 }
 0x173   :  { %2140 = vmatprep.subr.mxu0 %v2357_v36 }
 0x174   :  { %2141 = vmatpush3.msra.mxu0 %v1670_v3 }
 0x175   :  { %2142 = vmatprep.subr.mxu0 %v2357_v36 }
 0x176   :  { %2143 = vmatpush3.msra.mxu0 %v1669_v4 }
 0x177   :  { %2144 = vmatprep.subr.mxu0 %v2357_v36 }
 0x178   :  { %2145 = vmatpush3.msra.mxu0 %v1668_v5 }
 0x179   :  { %2146 = vmatprep.subr.mxu0 %v2357_v36 }
 0x17a   :  { %2147 = vmatpush3.msra.mxu0 %v1667_v6 }
 0x17b   :  { %2148 = vmatprep.subr.mxu0 %v2357_v36 }
 0x17c   :  { %2149 = vmatpush3.msra.mxu0 %v1666_v7 }
 0x17d   :  { %2150 = vmatprep.subr.mxu0 %v2357_v36 }
 0x17e   :  { %2151 = vmatpush3.msra.mxu0 %v1665_v8 }
 0x17f   :  { %2152 = vmatprep.subr.mxu0 %v2357_v36 }
 0x180   :  { %2153 = vmatpush3.msra.mxu0 %v1664_v9 }
 0x181   :  { %2154 = vmatprep.subr.mxu0 %v2357_v36 }
 0x182   :  { %2155 = vmatpush3.msra.mxu0 %v1663_v10 }
 0x183   :  { %2156 = vmatprep.subr.mxu0 %v2357_v36 }
 0x184   :  { %2157 = vmatpush3.msra.mxu0 %v1662_v11 }
 0x185   :  { %2158 = vmatprep.subr.mxu0 %v2357_v36 }
 0x186   :  { %2159 = vmatpush3.msra.mxu0 %v1661_v12 }
 0x227   :  { %v1541_v13 = vpop.f32.mrf.mxu0 }
 0x228   :  { %1546 = vst [vmem:[%s2590_s8] sm:$0xff] %v1541_v13 }
 0x229   :  { %v1543_v14 = vpop.f32.mrf.mxu0 }
 0x22a   :  { %1547 = vst [vmem:[%s2590_s8 + $0x8] sm:$0xff] %v1543_v14 }
 0x22b   :  { %v1655_v36 = vpop.f32.mrf.mxu1 }
 0x22c   :  { %v1656_v16 = vadd.f32 %v1896_v15, %v1655_v36 }
 0x22d   :  { %v2126_v17 = vpop.f32.mrf.mxu1 }
 0x22e   :  { %2161 = vmatmul.mubr.f32.vlgmr.msra.gmra.mxu0 %v1656_v16 }
 0x22f   :  { %v1658_v18 = vpop.f32.mrf.mxu1 }
 0x231   :  { %v2127_v19 = vpop.f32.mrf.mxu1 }
 0x2ee   :  { %v1743_v20 = vpop.f32.mrf.mxu0 }
 0x2ef   :  { %v1747_v22 = vadd.f32 %v1743_v20, %v1656_v16 }
 0x2f0   :  { %v2162_v23 = vpop.f32.mrf.mxu0 }
 0x2f1   :  { %v1755_v24 = vadd.f32 %v1905_v21, %v1747_v22 }
 0x2f3   :  { %1756 = vst [vmem:[%s2591_s9] sm:$0xff] %v1755_v24 }
 0x2f4   :  { %1765 = vsyncpa [#allocation3], 1 }
 0x2f5   :  { %1766 = vsyncpa [#allocation5], 1 }

</bundles_post_ra>
